<compile_context>
chip_gen: v6e
topology: v6e:2x2x1
jax: 0.10.0
libtpu: 0.0.40
codegen_flags: <defaults>
</compile_context>

<pallas_src>
import functools

import jax
import jax.numpy as jnp
from jax.experimental import pallas as pl
from jax.experimental.pallas import tpu as pltpu


# Double-buffered VMEM working-set target and explicit scoped-VMEM limit.
#   v5e / v6e : 128 MiB physical VMEM, 16 / 32 MiB default scoped limit.
#   v7x       :  64 MiB physical VMEM, 32 MiB default scoped limit.
# 24 MiB of double-buffered blocks (+ weights) stays well under the 48 MiB
# limit, which is legal on every generation and above every default.
_WORKING_SET_BYTES = 24 * 1024 * 1024
_VMEM_LIMIT_BYTES = 48 * 1024 * 1024
_MAX_IMAGES_PER_STEP = 8          # cap on the static per-step batch unroll


def _round_up(x, m):
    return (x + m - 1) // m * m


def _padded_block_bytes(nb, rows, lanes, itemsize):
    """VMEM bytes of an (nb, rows, lanes) block incl. (sublane, lane) padding."""
    sublane = 32 // itemsize      # 8 rows (f32), 16 (bf16), 32 (int8)
    return nb * _round_up(rows, sublane) * _round_up(lanes, 128) * itemsize


def _adjust_kernel(x_ref, w_ref, b_ref, o_ref, *, use_mxu, crop):
    # x_ref: (nb, C_in, T_in)   activation tile, lane axis = flattened H*W
    # w_ref: (C_out, C_in)      1x1-conv weight with BN scale folded in
    # b_ref: (C_out, 1)         folded BN bias (f32)
    # o_ref: (nb, C_out, T_out) output tile, lane-dense flattened spatial axis
    w = w_ref[...]
    b = b_ref[...]
    if not use_mxu:
        w = w.astype(jnp.float32)            # hoisted out of the image loop
    nb, c_in = x_ref.shape[0], x_ref.shape[1]
    for n in range(nb):                      # nb is a small static constant
        xn = x_ref[n]                        # (C_in, T_in)
        if use_mxu:
            y = jnp.dot(w, xn, preferred_element_type=jnp.float32)
        else:
            # Tiny-channel contraction on the VPU (no MXU latency / MRF pops).
            xf = xn.astype(jnp.float32)
            y = w[:, 0:1] * xf[0:1, :]
            for c in range(1, c_in):
                y = y + w[:, c:c + 1] * xf[c:c + 1, :]
        y = jnp.maximum(y + b, 0.0)          # fused BN bias + ReLU, f32
        if crop is None:
            o_ref[n] = y.astype(o_ref.dtype)
        else:
            # Fused center crop: y covers the full (H, W) extent flattened on
            # the lane axis; copy out the cs x cs center, one row at a time
            # (static lane slices + masked stores).
            left, cs, w_full = crop
            for h in range(cs):
                src = (left + h) * w_full + left
                o_ref[n, :, h * cs:(h + 1) * cs] = (
                    y[:, src:src + cs].astype(o_ref.dtype))


def adjust_layer_pallas(x_nchw, conv_w, bn_gamma, bn_beta, bn_mean, bn_var,
                        *, center_size=14, eps=1e-5, out_dtype=None):
    """AdjustLayer forward: optional center crop -> 1x1 conv -> BN(eval) -> ReLU.

    x_nchw : (N, C_in, H, W), f32 or bf16 (used as-is, no wrapper-side cast)
    conv_w : (C_out, C_in, 1, 1) f32 (PyTorch Conv2d weight layout)
    bn_*   : (C_out,) f32 running stats / affine params
    out_dtype : output dtype; defaults to x_nchw.dtype.
    Returns (N, C_out, H', W') with H' = W' = center_size when W < 20.
    """
    N, C_in, H, W = x_nchw.shape
    C_out = conv_w.shape[0]
    x_dtype = x_nchw.dtype
    out_dtype = jnp.dtype(x_dtype if out_dtype is None else out_dtype)

    do_crop = W < 20
    if do_crop:
        left = (W - center_size) // 2
        Hc = Wc = center_size
        crop = (left, center_size, W)        # static ints baked into the kernel
    else:
        Hc, Wc = H, W
        crop = None
    HW = H * W
    T_out_full = Hc * Wc

    # Uncropped NCHW -> (N, C_in, H*W): contiguous, i.e. a free reshape.
    x = x_nchw.reshape(N, C_in, HW)

    # Fold BatchNorm (inference mode): scale into the weight, keep the bias.
    # (For bf16 inputs the folded weight is cast to bf16: small precision loss.)
    scale = bn_gamma / jnp.sqrt(bn_var + eps)                        # (C_out,)
    bias = (bn_beta - bn_mean * scale).reshape(C_out, 1).astype(jnp.float32)
    w = (conv_w.reshape(C_out, C_in) * scale[:, None]).astype(x_dtype)

    # ---- byte-budgeted, padding-aware tile selection ------------------------
    xi = jnp.dtype(x_dtype).itemsize
    oi = out_dtype.itemsize
    w_bytes = 2 * (_padded_block_bytes(1, C_out, C_in, xi)
                   + _padded_block_bytes(1, C_out, 1, 4))
    budget = max(_WORKING_SET_BYTES - w_bytes, 2 * 1024 * 1024)

    def blk_bytes(nb, t_in, t_out):          # double-buffered activation+output
        return 2 * nb * (_padded_block_bytes(1, C_in, t_in, xi)
                         + _padded_block_bytes(1, C_out, t_out, oi))

    if do_crop:
        # Crop path: spatial extent is tiny (W < 20) -> one full-HW tile.
        t_in, t_out, n_hw = HW, T_out_full, 1
    elif blk_bytes(1, HW, HW) <= budget:
        t_in = t_out = HW
        n_hw = 1
    else:
        per_128 = blk_bytes(1, 128, 128)     # linear in t for 128-multiples
        t_hw = max(128, (budget // per_128) * 128)
        t_hw = min(t_hw, _round_up(HW, 128))
        t_in = t_out = t_hw
        n_hw = -(-HW // t_hw)

    if n_hw == 1:
        # Batch several images per step (amortize per-step overhead), but keep
        # at least two grid steps when N >= 2 so both v7x TensorCores get work.
        nb = min(N, _MAX_IMAGES_PER_STEP,
                 max(1, budget // blk_bytes(1, t_in, t_out)))
        if N >= 2:
            nb = min(nb, -(-N // 2))
        while N % nb:                        # exact tiling of the batch axis
            nb -= 1
    else:
        nb = 1

    if crop is None and N == 1 and n_hw == 1 and HW >= 512:
        # Single image, single tile: split the spatial axis so both v7x
        # TensorCores have work.
        t_hw = _round_up(-(-HW // 2), 128)
        t_in = t_out = t_hw
        n_hw = -(-HW // t_hw)

    # Tiny channel counts -> skinny contraction on the VPU instead of the MXU.
    use_mxu = (C_in > 8) or (C_out > 32)

    grid = (N // nb, n_hw)
    out = pl.pallas_call(
        functools.partial(_adjust_kernel, use_mxu=use_mxu, crop=crop),
        out_shape=jax.ShapeDtypeStruct((N, C_out, T_out_full), out_dtype),
        grid=grid,
        in_specs=[
            # Activation: nb images, one spatial tile (lane axis = H*W).
            pl.BlockSpec((nb, C_in, t_in), lambda i, j: (i, 0, j)),
            # Weight + bias: constant index map -> resident across the grid.
            pl.BlockSpec((C_out, C_in), lambda i, j: (0, 0)),
            pl.BlockSpec((C_out, 1), lambda i, j: (0, 0)),
        ],
        out_specs=pl.BlockSpec((nb, C_out, t_out), lambda i, j: (i, 0, j)),
        compiler_params=pltpu.CompilerParams(
            dimension_semantics=("parallel", "parallel"),
            vmem_limit_bytes=_VMEM_LIMIT_BYTES),
    )(x, w, bias)

    # (N, C_out, Hc*Wc) -> (N, C_out, Hc, Wc): contiguous, free.
    return out.reshape(N, C_out, Hc, Wc)


def _reference(x_nchw, conv_w, bn_gamma, bn_beta, bn_mean, bn_var,
               *, center_size=14, eps=1e-5):
    N, C_in, H, W = x_nchw.shape
    C_out = conv_w.shape[0]
    if W < 20:
        left = (W - center_size) // 2
        right = left + center_size
        x_nchw = x_nchw[:, :, left:right, left:right]
    w = conv_w.reshape(C_out, C_in).astype(jnp.float32)
    y = jnp.einsum("nchw,oc->nohw", x_nchw.astype(jnp.float32), w,
                   precision=jax.lax.Precision.HIGHEST)
    scale = (bn_gamma / jnp.sqrt(bn_var + eps)).reshape(1, C_out, 1, 1)
    bias = (bn_beta - bn_mean * bn_gamma / jnp.sqrt(bn_var + eps)).reshape(
        1, C_out, 1, 1)
    return jnp.maximum(y * scale + bias, 0.0)


if __name__ == "__main__":
    key = jax.random.PRNGKey(0)
    keys = jax.random.split(key, 12)

    N, C_in, H, W = 2, 4, 16, 16      # W < 20 -> center crop to 14x14
    C_out = 8
    center_size = 14

    x = jax.random.normal(keys[0], (N, C_in, H, W), dtype=jnp.float32)
    conv_w = jax.random.normal(keys[1], (C_out, C_in, 1, 1), jnp.float32) * 0.1
    bn_gamma = 1.0 + 0.1 * jax.random.normal(keys[2], (C_out,), jnp.float32)
    bn_beta = 0.1 * jax.random.normal(keys[3], (C_out,), jnp.float32)
    bn_mean = 0.1 * jax.random.normal(keys[4], (C_out,), jnp.float32)
    bn_var = jnp.abs(jax.random.normal(keys[5], (C_out,), jnp.float32)) + 0.5

    fwd = jax.jit(functools.partial(adjust_layer_pallas, center_size=center_size))

    # 1) f32, crop path (fused in-kernel crop), tiny-channel VPU contraction.
    ref = _reference(x, conv_w, bn_gamma, bn_beta, bn_mean, bn_var,
                     center_size=center_size)
    out = jax.block_until_ready(
        fwd(x, conv_w, bn_gamma, bn_beta, bn_mean, bn_var))
    assert out.shape == (N, C_out, center_size, center_size), out.shape
    assert out.dtype == jnp.float32
    assert jnp.allclose(out, ref, atol=1e-4, rtol=1e-4), "f32 crop path mismatch"

    # 2) f32, no-crop path (W >= 20): lane-dense flat spatial tiles.
    x2 = jax.random.normal(keys[6], (N, C_in, 24, 24), dtype=jnp.float32)
    ref2 = _reference(x2, conv_w, bn_gamma, bn_beta, bn_mean, bn_var,
                      center_size=center_size)
    out2 = jax.block_until_ready(
        fwd(x2, conv_w, bn_gamma, bn_beta, bn_mean, bn_var))
    assert out2.shape == (N, C_out, 24, 24), out2.shape
    assert jnp.allclose(out2, ref2, atol=1e-4, rtol=1e-4), "f32 no-crop mismatch"

    # 3) bf16 in / bf16 out (no wrapper-side cast: caller supplies bf16).
    fwd_bf = jax.jit(functools.partial(
        adjust_layer_pallas, center_size=center_size, out_dtype=jnp.bfloat16))
    out_bf = jax.block_until_ready(
        fwd_bf(x.astype(jnp.bfloat16), conv_w, bn_gamma, bn_beta, bn_mean, bn_var))
    assert out_bf.dtype == jnp.bfloat16
    assert jnp.allclose(out_bf.astype(jnp.float32), ref, atol=5e-2, rtol=5e-2), \
        "bf16 path mismatch"

    # 4) MXU path (larger channel counts) with the fused crop.
    C_in4, C_out4 = 32, 16
    x4 = jax.random.normal(keys[7], (N, C_in4, H, W), dtype=jnp.float32)
    conv_w4 = jax.random.normal(keys[8], (C_out4, C_in4, 1, 1), jnp.float32) * 0.1
    g4 = 1.0 + 0.1 * jax.random.normal(keys[9], (C_out4,), jnp.float32)
    b4 = 0.1 * jax.random.normal(keys[10], (C_out4,), jnp.float32)
    m4 = 0.1 * jax.random.normal(keys[11], (C_out4,), jnp.float32)
    v4 = jnp.abs(jax.random.normal(keys[5], (C_out4,), jnp.float32)) + 0.5
    ref4 = _reference(x4, conv_w4, g4, b4, m4, v4, center_size=center_size)
    out4 = jax.block_until_ready(fwd(x4, conv_w4, g4, b4, m4, v4))
    assert out4.shape == (N, C_out4, center_size, center_size), out4.shape
    assert jnp.allclose(out4, ref4, atol=1e-3, rtol=1e-3), "MXU crop path mismatch"

    print("KERNEL_OK")
</pallas_src>

<mosaic_0001>
module attributes {stable_mosaic.version = 11 : i64} {
  func.func @_adjust_kernel(%arg0: i32, %arg1: i32, %arg2: memref<1x4x256xf32, #tpu.memory_space<vmem>>, %arg3: memref<8x4xf32, #tpu.memory_space<vmem>>, %arg4: memref<8x1xf32, #tpu.memory_space<vmem>>, %arg5: memref<1x8x196xf32, #tpu.memory_space<vmem>>) attributes {dimension_semantics = [#tpu.dimension_semantics<parallel>, #tpu.dimension_semantics<parallel>], iteration_bounds = array<i64: 2, 1>, scalar_prefetch = 0 : i64, scratch_operands = 0 : i64, tpu.core_type = #tpu.core_type<tc>, window_params = [{transform_indices = @transform_0, window_bounds = array<i64: 1, 4, 256>}, {pipeline_mode = #tpu.pipeline_mode<synchronous>, transform_indices = @transform_1, window_bounds = array<i64: 8, 4>}, {pipeline_mode = #tpu.pipeline_mode<synchronous>, transform_indices = @transform_2, window_bounds = array<i64: 8, 1>}, {transform_indices = @transform_3, window_bounds = array<i64: 1, 8, 196>}]} {
    %c0 = arith.constant 0 : index
    %c0_0 = arith.constant 0 : index
    %0 = vector.load %arg3[%c0, %c0_0] : memref<8x4xf32, #tpu.memory_space<vmem>>, vector<8x4xf32>
    %c0_1 = arith.constant 0 : index
    %c0_2 = arith.constant 0 : index
    %1 = vector.load %arg4[%c0_1, %c0_2] : memref<8x1xf32, #tpu.memory_space<vmem>>, vector<8x1xf32>
    %c0_3 = arith.constant 0 : index
    %c0_4 = arith.constant 0 : index
    %c0_5 = arith.constant 0 : index
    %2 = vector.load %arg2[%c0_3, %c0_4, %c0_5] : memref<1x4x256xf32, #tpu.memory_space<vmem>>, vector<1x4x256xf32>
    %3 = vector.shape_cast %2 : vector<1x4x256xf32> to vector<4x256xf32>
    %4 = vector.extract_strided_slice %0 {offsets = [0, 0], sizes = [8, 1], strides = [1, 1]} : vector<8x4xf32> to vector<8x1xf32>
    %5 = vector.extract_strided_slice %3 {offsets = [0, 0], sizes = [1, 256], strides = [1, 1]} : vector<4x256xf32> to vector<1x256xf32>
    %6 = vector.broadcast %4 : vector<8x1xf32> to vector<8x256xf32>
    %7 = vector.broadcast %5 : vector<1x256xf32> to vector<8x256xf32>
    %8 = arith.mulf %6, %7 : vector<8x256xf32>
    %9 = vector.extract_strided_slice %0 {offsets = [0, 1], sizes = [8, 1], strides = [1, 1]} : vector<8x4xf32> to vector<8x1xf32>
    %10 = vector.extract_strided_slice %3 {offsets = [1, 0], sizes = [1, 256], strides = [1, 1]} : vector<4x256xf32> to vector<1x256xf32>
    %11 = vector.broadcast %9 : vector<8x1xf32> to vector<8x256xf32>
    %12 = vector.broadcast %10 : vector<1x256xf32> to vector<8x256xf32>
    %13 = arith.mulf %11, %12 : vector<8x256xf32>
    %14 = arith.addf %8, %13 : vector<8x256xf32>
    %15 = vector.extract_strided_slice %0 {offsets = [0, 2], sizes = [8, 1], strides = [1, 1]} : vector<8x4xf32> to vector<8x1xf32>
    %16 = vector.extract_strided_slice %3 {offsets = [2, 0], sizes = [1, 256], strides = [1, 1]} : vector<4x256xf32> to vector<1x256xf32>
    %17 = vector.broadcast %15 : vector<8x1xf32> to vector<8x256xf32>
    %18 = vector.broadcast %16 : vector<1x256xf32> to vector<8x256xf32>
    %19 = arith.mulf %17, %18 : vector<8x256xf32>
    %20 = arith.addf %14, %19 : vector<8x256xf32>
    %21 = vector.extract_strided_slice %0 {offsets = [0, 3], sizes = [8, 1], strides = [1, 1]} : vector<8x4xf32> to vector<8x1xf32>
    %22 = vector.extract_strided_slice %3 {offsets = [3, 0], sizes = [1, 256], strides = [1, 1]} : vector<4x256xf32> to vector<1x256xf32>
    %23 = vector.broadcast %21 : vector<8x1xf32> to vector<8x256xf32>
    %24 = vector.broadcast %22 : vector<1x256xf32> to vector<8x256xf32>
    %25 = arith.mulf %23, %24 : vector<8x256xf32>
    %26 = arith.addf %20, %25 : vector<8x256xf32>
    %27 = vector.broadcast %1 : vector<8x1xf32> to vector<8x256xf32>
    %28 = arith.addf %26, %27 : vector<8x256xf32>
    %cst = arith.constant 0.000000e+00 : f32
    %29 = vector.broadcast %cst : f32 to vector<8x256xf32>
    %30 = arith.maximumf %28, %29 : vector<8x256xf32>
    %31 = vector.extract_strided_slice %30 {offsets = [0, 17], sizes = [8, 14], strides = [1, 1]} : vector<8x256xf32> to vector<8x14xf32>
    %c0_6 = arith.constant 0 : index
    %c0_7 = arith.constant 0 : index
    %c0_8 = arith.constant 0 : index
    %32 = vector.load %arg5[%c0_6, %c0_7, %c0_8] : memref<1x8x196xf32, #tpu.memory_space<vmem>>, vector<1x8x14xf32>
    %33 = vector.shape_cast %32 : vector<1x8x14xf32> to vector<8x14xf32>
    %34 = vector.shape_cast %31 : vector<8x14xf32> to vector<1x8x14xf32>
    tpu.vector_store %arg5[%c0_6, %c0_7, %c0_8], %34 {strides = array<i32>} : memref<1x8x196xf32, #tpu.memory_space<vmem>>, vector<1x8x14xf32>,
    %35 = vector.extract_strided_slice %30 {offsets = [0, 33], sizes = [8, 14], strides = [1, 1]} : vector<8x256xf32> to vector<8x14xf32>
    %c0_9 = arith.constant 0 : index
    %c0_10 = arith.constant 0 : index
    %c14 = arith.constant 14 : index
    %36 = vector.load %arg5[%c0_9, %c0_10, %c14] : memref<1x8x196xf32, #tpu.memory_space<vmem>>, vector<1x8x14xf32>
    %37 = vector.shape_cast %36 : vector<1x8x14xf32> to vector<8x14xf32>
    %38 = vector.shape_cast %35 : vector<8x14xf32> to vector<1x8x14xf32>
    tpu.vector_store %arg5[%c0_9, %c0_10, %c14], %38 {strides = array<i32>} : memref<1x8x196xf32, #tpu.memory_space<vmem>>, vector<1x8x14xf32>,
    %39 = vector.extract_strided_slice %30 {offsets = [0, 49], sizes = [8, 14], strides = [1, 1]} : vector<8x256xf32> to vector<8x14xf32>
    %c0_11 = arith.constant 0 : index
    %c0_12 = arith.constant 0 : index
    %c28 = arith.constant 28 : index
    %40 = vector.load %arg5[%c0_11, %c0_12, %c28] : memref<1x8x196xf32, #tpu.memory_space<vmem>>, vector<1x8x14xf32>
    %41 = vector.shape_cast %40 : vector<1x8x14xf32> to vector<8x14xf32>
    %42 = vector.shape_cast %39 : vector<8x14xf32> to vector<1x8x14xf32>
    tpu.vector_store %arg5[%c0_11, %c0_12, %c28], %42 {strides = array<i32>} : memref<1x8x196xf32, #tpu.memory_space<vmem>>, vector<1x8x14xf32>,
    %43 = vector.extract_strided_slice %30 {offsets = [0, 65], sizes = [8, 14], strides = [1, 1]} : vector<8x256xf32> to vector<8x14xf32>
    %c0_13 = arith.constant 0 : index
    %c0_14 = arith.constant 0 : index
    %c42 = arith.constant 42 : index
    %44 = vector.load %arg5[%c0_13, %c0_14, %c42] : memref<1x8x196xf32, #tpu.memory_space<vmem>>, vector<1x8x14xf32>
    %45 = vector.shape_cast %44 : vector<1x8x14xf32> to vector<8x14xf32>
    %46 = vector.shape_cast %43 : vector<8x14xf32> to vector<1x8x14xf32>
    tpu.vector_store %arg5[%c0_13, %c0_14, %c42], %46 {strides = array<i32>} : memref<1x8x196xf32, #tpu.memory_space<vmem>>, vector<1x8x14xf32>,
    %47 = vector.extract_strided_slice %30 {offsets = [0, 81], sizes = [8, 14], strides = [1, 1]} : vector<8x256xf32> to vector<8x14xf32>
    %c0_15 = arith.constant 0 : index
    %c0_16 = arith.constant 0 : index
    %c56 = arith.constant 56 : index
    %48 = vector.load %arg5[%c0_15, %c0_16, %c56] : memref<1x8x196xf32, #tpu.memory_space<vmem>>, vector<1x8x14xf32>
    %49 = vector.shape_cast %48 : vector<1x8x14xf32> to vector<8x14xf32>
    %50 = vector.shape_cast %47 : vector<8x14xf32> to vector<1x8x14xf32>
    tpu.vector_store %arg5[%c0_15, %c0_16, %c56], %50 {strides = array<i32>} : memref<1x8x196xf32, #tpu.memory_space<vmem>>, vector<1x8x14xf32>,
    %51 = vector.extract_strided_slice %30 {offsets = [0, 97], sizes = [8, 14], strides = [1, 1]} : vector<8x256xf32> to vector<8x14xf32>
    %c0_17 = arith.constant 0 : index
    %c0_18 = arith.constant 0 : index
    %c70 = arith.constant 70 : index
    %52 = vector.load %arg5[%c0_17, %c0_18, %c70] : memref<1x8x196xf32, #tpu.memory_space<vmem>>, vector<1x8x14xf32>
    %53 = vector.shape_cast %52 : vector<1x8x14xf32> to vector<8x14xf32>
    %54 = vector.shape_cast %51 : vector<8x14xf32> to vector<1x8x14xf32>
    tpu.vector_store %arg5[%c0_17, %c0_18, %c70], %54 {strides = array<i32>} : memref<1x8x196xf32, #tpu.memory_space<vmem>>, vector<1x8x14xf32>,
    %55 = vector.extract_strided_slice %30 {offsets = [0, 113], sizes = [8, 14], strides = [1, 1]} : vector<8x256xf32> to vector<8x14xf32>
    %c0_19 = arith.constant 0 : index
    %c0_20 = arith.constant 0 : index
    %c84 = arith.constant 84 : index
    %56 = vector.load %arg5[%c0_19, %c0_20, %c84] : memref<1x8x196xf32, #tpu.memory_space<vmem>>, vector<1x8x14xf32>
    %57 = vector.shape_cast %56 : vector<1x8x14xf32> to vector<8x14xf32>
    %58 = vector.shape_cast %55 : vector<8x14xf32> to vector<1x8x14xf32>
    tpu.vector_store %arg5[%c0_19, %c0_20, %c84], %58 {strides = array<i32>} : memref<1x8x196xf32, #tpu.memory_space<vmem>>, vector<1x8x14xf32>,
    %59 = vector.extract_strided_slice %30 {offsets = [0, 129], sizes = [8, 14], strides = [1, 1]} : vector<8x256xf32> to vector<8x14xf32>
    %c0_21 = arith.constant 0 : index
    %c0_22 = arith.constant 0 : index
    %c98 = arith.constant 98 : index
    %60 = vector.load %arg5[%c0_21, %c0_22, %c98] : memref<1x8x196xf32, #tpu.memory_space<vmem>>, vector<1x8x14xf32>
    %61 = vector.shape_cast %60 : vector<1x8x14xf32> to vector<8x14xf32>
    %62 = vector.shape_cast %59 : vector<8x14xf32> to vector<1x8x14xf32>
    tpu.vector_store %arg5[%c0_21, %c0_22, %c98], %62 {strides = array<i32>} : memref<1x8x196xf32, #tpu.memory_space<vmem>>, vector<1x8x14xf32>,
    %63 = vector.extract_strided_slice %30 {offsets = [0, 145], sizes = [8, 14], strides = [1, 1]} : vector<8x256xf32> to vector<8x14xf32>
    %c0_23 = arith.constant 0 : index
    %c0_24 = arith.constant 0 : index
    %c112 = arith.constant 112 : index
    %64 = vector.load %arg5[%c0_23, %c0_24, %c112] : memref<1x8x196xf32, #tpu.memory_space<vmem>>, vector<1x8x14xf32>
    %65 = vector.shape_cast %64 : vector<1x8x14xf32> to vector<8x14xf32>
    %66 = vector.shape_cast %63 : vector<8x14xf32> to vector<1x8x14xf32>
    tpu.vector_store %arg5[%c0_23, %c0_24, %c112], %66 {strides = array<i32>} : memref<1x8x196xf32, #tpu.memory_space<vmem>>, vector<1x8x14xf32>,
    %67 = vector.extract_strided_slice %30 {offsets = [0, 161], sizes = [8, 14], strides = [1, 1]} : vector<8x256xf32> to vector<8x14xf32>
    %c0_25 = arith.constant 0 : index
    %c0_26 = arith.constant 0 : index
    %c126 = arith.constant 126 : index
    %68 = vector.load %arg5[%c0_25, %c0_26, %c126] : memref<1x8x196xf32, #tpu.memory_space<vmem>>, vector<1x8x14xf32>
    %69 = vector.shape_cast %68 : vector<1x8x14xf32> to vector<8x14xf32>
    %70 = vector.shape_cast %67 : vector<8x14xf32> to vector<1x8x14xf32>
    tpu.vector_store %arg5[%c0_25, %c0_26, %c126], %70 {strides = array<i32>} : memref<1x8x196xf32, #tpu.memory_space<vmem>>, vector<1x8x14xf32>,
    %71 = vector.extract_strided_slice %30 {offsets = [0, 177], sizes = [8, 14], strides = [1, 1]} : vector<8x256xf32> to vector<8x14xf32>
    %c0_27 = arith.constant 0 : index
    %c0_28 = arith.constant 0 : index
    %c140 = arith.constant 140 : index
    %72 = vector.load %arg5[%c0_27, %c0_28, %c140] : memref<1x8x196xf32, #tpu.memory_space<vmem>>, vector<1x8x14xf32>
    %73 = vector.shape_cast %72 : vector<1x8x14xf32> to vector<8x14xf32>
    %74 = vector.shape_cast %71 : vector<8x14xf32> to vector<1x8x14xf32>
    tpu.vector_store %arg5[%c0_27, %c0_28, %c140], %74 {strides = array<i32>} : memref<1x8x196xf32, #tpu.memory_space<vmem>>, vector<1x8x14xf32>,
    %75 = vector.extract_strided_slice %30 {offsets = [0, 193], sizes = [8, 14], strides = [1, 1]} : vector<8x256xf32> to vector<8x14xf32>
    %c0_29 = arith.constant 0 : index
    %c0_30 = arith.constant 0 : index
    %c154 = arith.constant 154 : index
    %76 = vector.load %arg5[%c0_29, %c0_30, %c154] : memref<1x8x196xf32, #tpu.memory_space<vmem>>, vector<1x8x14xf32>
    %77 = vector.shape_cast %76 : vector<1x8x14xf32> to vector<8x14xf32>
    %78 = vector.shape_cast %75 : vector<8x14xf32> to vector<1x8x14xf32>
    tpu.vector_store %arg5[%c0_29, %c0_30, %c154], %78 {strides = array<i32>} : memref<1x8x196xf32, #tpu.memory_space<vmem>>, vector<1x8x14xf32>,
    %79 = vector.extract_strided_slice %30 {offsets = [0, 209], sizes = [8, 14], strides = [1, 1]} : vector<8x256xf32> to vector<8x14xf32>
    %c0_31 = arith.constant 0 : index
    %c0_32 = arith.constant 0 : index
    %c168 = arith.constant 168 : index
    %80 = vector.load %arg5[%c0_31, %c0_32, %c168] : memref<1x8x196xf32, #tpu.memory_space<vmem>>, vector<1x8x14xf32>
    %81 = vector.shape_cast %80 : vector<1x8x14xf32> to vector<8x14xf32>
    %82 = vector.shape_cast %79 : vector<8x14xf32> to vector<1x8x14xf32>
    tpu.vector_store %arg5[%c0_31, %c0_32, %c168], %82 {strides = array<i32>} : memref<1x8x196xf32, #tpu.memory_space<vmem>>, vector<1x8x14xf32>,
    %83 = vector.extract_strided_slice %30 {offsets = [0, 225], sizes = [8, 14], strides = [1, 1]} : vector<8x256xf32> to vector<8x14xf32>
    %c0_33 = arith.constant 0 : index
    %c0_34 = arith.constant 0 : index
    %c182 = arith.constant 182 : index
    %84 = vector.load %arg5[%c0_33, %c0_34, %c182] : memref<1x8x196xf32, #tpu.memory_space<vmem>>, vector<1x8x14xf32>
    %85 = vector.shape_cast %84 : vector<1x8x14xf32> to vector<8x14xf32>
    %86 = vector.shape_cast %83 : vector<8x14xf32> to vector<1x8x14xf32>
    tpu.vector_store %arg5[%c0_33, %c0_34, %c182], %86 {strides = array<i32>} : memref<1x8x196xf32, #tpu.memory_space<vmem>>, vector<1x8x14xf32>,
    return
  }
  func.func @transform_0(%arg0: i32, %arg1: i32) -> (i32, i32, i32) {
    %c0_i32 = arith.constant 0 : i32
    %c0_i32_0 = arith.constant 0 : i32
    return %arg0, %c0_i32, %arg1 : i32, i32, i32
  }
  func.func @transform_1(%arg0: i32, %arg1: i32) -> (i32, i32) {
    %c0_i32 = arith.constant 0 : i32
    %c0_i32_0 = arith.constant 0 : i32
    %c0_i32_1 = arith.constant 0 : i32
    return %c0_i32, %c0_i32_0 : i32, i32
  }
  func.func @transform_2(%arg0: i32, %arg1: i32) -> (i32, i32) {
    %c0_i32 = arith.constant 0 : i32
    %c0_i32_0 = arith.constant 0 : i32
    %c0_i32_1 = arith.constant 0 : i32
    return %c0_i32, %c0_i32_0 : i32, i32
  }
  func.func @transform_3(%arg0: i32, %arg1: i32) -> (i32, i32, i32) {
    %c0_i32 = arith.constant 0 : i32
    %c0_i32_0 = arith.constant 0 : i32
    return %arg0, %c0_i32, %arg1 : i32, i32, i32
  }
}

</mosaic_0001>

<bundles_post_ra>
// kernel: adjust_layer_pallas.1
= control target key start
LH: loop header
LB: loop body
LE: loop exit
PB: predicated region body
PF: predicated region fallthrough
CT: control target
= control target key end

     0   :  { %s610_s12 = smov 0   ;;  %s612_s13 = smov 0   ;;  %s670_s0 = inlined_call_operand.vmem [shape: f32[2,4,256], index: 0, kind: input, shape index: {}]   ;;  %s671_s1 = inlined_call_operand.vmem [shape: f32[8,4], index: 1, kind: input, shape index: {}]   ;;  %s672_s2 = inlined_call_operand.vmem [shape: f32[8,1], index: 2, kind: input, shape index: {}]   ;;  %s673_s3 = inlined_call_operand.vmem [shape: f32[2,8,196], index: 3, kind: output, shape index: {}]  }
   0x1   :  { %s614_s14 = smov 0  }
   0x2 LB: > { %s25_s15 = sadd.s32 1, %s566_s13  ;;  %p491_p0 = scmp.ge.s32.totalorder %s570_s14, 1  ;;  %s570_s14 = sphi %s614_s14, %s13_s14   ;;  %s566_s13 = sphi %s612_s13, %s675_s13   ;;  %s562_s12 = sphi %s610_s12, %s674_s12  }
   0x3   : > { %p27_p1 = scmp.ge.s32.totalorder %s25_s15, 2  ;;  %p158_p2 = scmp.lt.s32.totalorder %s570_s14, 3 }
   0x5   : > { %s677_s15 = smov (%p27_p1, %s25_s15), 0  ;;  %p159_p3 = pnand %p491_p0, %p158_p2 }
   0x6   : > { %p191_p4 = scmp.lt.s32.totalorder (!%p159_p3), %s562_s12, 1  ;;  %s576_s24 = smov (!%p159_p3), 109  }
   0x7   : > { %162 = sbr.rel (%p159_p3) target bundleno = 296 (0x128), region = 32  ;;  %s577_s25 = smov (!%p159_p3), 111  }
   0x8   : > { %s578_s26 = smov (!%p159_p3), 105   ;;  %s579_s27 = smov (!%p159_p3), 107  }
   0x9   : > { %s580_s28 = smov (!%p159_p3), 101   ;;  %s581_s29 = smov (!%p159_p3), 103  }
   0xa   : > { %s582_s30 = smov (!%p159_p3), 99   ;;  %s583_s4 = smov (!%p159_p3), 93  }
   0xb   : > { %s584_s5 = smov (!%p159_p3), 97   ;;  %s585_s6 = smov (!%p159_p3), 91  }
   0xc   : > { %v210_v0 = vld [vmem:[%s671_s1] sm:$0xff]  ;;  %v572_v1 = vmov 0   ;;  %v573_v2 = vmov 2   ;;  %v574_v3 = vmov 1   ;;  %v575_v4 = vmov 3   ;;  %s679_s12 = smov (!%p191_p4, %s562_s12), 1 }
   0xd   : > { %542 = vset.pattern.permute.xlu0 %v572_v1  ;;  %544 = vset.pattern.permute.xlu1 %v573_v2  ;;  %v211_v5 = vld [vmem:[%s672_s2] sm:$0xff]  ;;  %v219_v6 = vlaneseq  ;;  %s498_s20 = sshll.u32 %s679_s12, 3  ;;  %s586_s7 = smov 95   ;;  %vm330_vm0 = vcmask 113664   ;;  %vm335_vm1 = vcmask 228464   ;;  %vm340_vm2 = vcmask 343264  }
   0xe   : > { %215 = vperm.xlu0 %542, %v210_v0   ;;  %266 = vperm.xlu1 %544, %v210_v0   ;;  %s198_s23 = scalar_lea.vmem %s670_s0, %s498_s20  ;;  %s587_s8 = smov 89   ;;  %vm345_vm3 = vcmask 458064   ;;  %vm350_vm4 = vcmask 572864   ;;  %vm355_vm5 = vcmask 687664   ;;  %vm360_vm6 = vcmask 802464  }
   0xf   : > { %v220_v7 = vshrl.u32 %v219_v6, 7  ;;  %v212_v10 = vld [vmem:[%s198_s23] sm:$0xff]  ;;  %s588_s9 = smov 85   ;;  %s589_s10 = smov 87   ;;  %vm378_vm7 = vcmask 97280   ;;  %vm366_vm8 = vcmask 917264  }
  0x10   : > { %s499_s11 = sshll.u32 %s679_s12, 4  ;;  %vm383_vm9 = vcmask 212064   ;;  %vm371_vm10 = vcmask 1032064   ;;  %vm388_vm11 = vcmask 326864   ;;  %vm376_vm12 = vcmask 1048560  }
  0x11   : > { %v221_v8 = vsub.s32 0, %v220_v7  ;;  %v245_v9 = vsub.s32 1, %v220_v7  ;;  %v271_v11 = vsub.s32 2, %v220_v7  ;;  %v249_v12 = vsub.s32 5, %v220_v7  ;;  %s644_s18 = scalar_lea.vmem %s673_s3, %s499_s11 }
  0x12   : > { %543 = vset.pattern.permute.xlu0 %v574_v3  ;;  %545 = vset.pattern.permute.xlu1 %v575_v4  ;;  %v297_v13 = vsub.s32 3, %v220_v7  ;;  %v225_v14 = vsub.s32 4, %v220_v7  ;;  %v275_v24 = vsub.s32 6, %v220_v7  ;;  %v301_v26 = vsub.s32 7, %v220_v7 }
  0x13   : > { %240 = vperm.xlu0 %543, %v210_v0   ;;  %292 = vperm.xlu1 %545, %v210_v0   ;;  %v222_v15 = vrot.slane %v212_v10, %v221_v8  ;;  %v246_v16 = vrot.slane %v212_v10, %v245_v9  ;;  %v272_v19 = vrot.slane %v212_v10, %v271_v11  ;;  %vm393_vm13 = vcmask 441664  }
  0x14   : > { %v250_v20 = vrot.slane %v212_v10, %v249_v12  ;;  %v298_v21 = vrot.slane %v212_v10, %v297_v13  ;;  %v226_v22 = vrot.slane %v212_v10, %v225_v14  ;;  %v276_v34 = vrot.slane %v212_v10, %v275_v24 }
  0x15   : > { %v232_v23 = vrot.slane %v222_v15, %v221_v8  ;;  %v256_v25 = vrot.slane %v246_v16, %v245_v9  ;;  %v282_v27 = vrot.slane %v272_v19, %v271_v11  ;;  %v302_v36 = vrot.slane %v212_v10, %v301_v26 }
  0x16   : > { %v260_v28 = vrot.slane %v250_v20, %v245_v9  ;;  %v308_v29 = vrot.slane %v298_v21, %v297_v13  ;;  %v236_v32 = vrot.slane %v226_v22, %v221_v8  ;;  %v286_v42 = vrot.slane %v276_v34, %v271_v11 }
  0x17   : > { %546 = vset.pattern.permute.xlu1 %v572_v1  ;;  %547 = vset.pattern.permute.xlu0 %v572_v1  ;;  %v312_v46 = vrot.slane %v302_v36, %v297_v13  ;;  %vm398_vm14 = vcmask 556464  }
  0x18   : > { %319 = vperm.xlu1 %546, %v211_v5  }
  0x89   : > { %v216_v17 = vpop.permute.xlu0 %215  ;;  %v267_v18 = vpop.permute.xlu1 %266 }
  0x8a   : > { %v237_v33 = vmul.f32 %v232_v23, %v216_v17  ;;  %v287_v37 = vmul.f32 %v282_v27, %v267_v18  ;;  %v238_v41 = vmul.f32 %v236_v32, %v216_v17  ;;  %v288_v48 = vmul.f32 %v286_v42, %v267_v18 }
  0x8e   : > { %v241_v30 = vpop.permute.xlu0 %240  ;;  %v293_v31 = vpop.permute.xlu1 %292 }
  0x8f   : > { %v261_v35 = vmul.f32 %v256_v25, %v241_v30  ;;  %v262_v38 = vmul.f32 %v260_v28, %v241_v30  ;;  %v313_v40 = vmul.f32 %v308_v29, %v293_v31  ;;  %v314_v50 = vmul.f32 %v312_v46, %v293_v31 }
  0x91   : > { %v263_v39 = vadd.f32 %v261_v35, %v237_v33  ;;  %v264_v45 = vadd.f32 %v262_v38, %v238_v41 }
  0x93   : > { %v289_v43 = vadd.f32 %v287_v37, %v263_v39  ;;  %v320_v44 = vpop.permute.xlu1 %319  ;;  %v290_v51 = vadd.f32 %v288_v48, %v264_v45 }
  0x95   : > { %v315_v47 = vadd.f32 %v313_v40, %v289_v43  ;;  %v316_v53 = vadd.f32 %v314_v50, %v290_v51 }
  0x97   : > { %v322_v49 = vadd.f32 %v320_v44, %v315_v47  ;;  %v323_v54 = vadd.f32 %v320_v44, %v316_v53 }
  0x99   : > { %v324_v52 = vmax.f32 %v322_v49, 0.0  ;;  %v325_v55 = vmax.f32 %v323_v54, 0.0 }
  0x9b   : > { %332 = vrot.lane.b32.xlu1 %v324_v52, %s576_s24  ;;  %327 = vrot.lane.b32.xlu0 %v324_v52, %s577_s25 }
  0x9f   : > { %342 = vrot.lane.b32.xlu1 %v324_v52, %s578_s26  ;;  %337 = vrot.lane.b32.xlu0 %v324_v52, %s579_s27 }
  0xa3   : > { %352 = vrot.lane.b32.xlu1 %v324_v52, %s580_s28  ;;  %347 = vrot.lane.b32.xlu0 %v324_v52, %s581_s29 }
  0xa7   : > { %357 = vrot.lane.b32.xlu1 %v324_v52, %s582_s30  ;;  %373 = vrot.lane.b32.xlu0 %v325_v55, %s583_s4 }
  0xab   : > { %363 = vrot.lane.b32.xlu1 %v325_v55, %s584_s5  ;;  %380 = vrot.lane.b32.xlu0 %v325_v55, %s585_s6 }
  0xaf   : > { %368 = vrot.lane.b32.xlu1 %v325_v55, %s586_s7  ;;  %385 = vrot.lane.b32.xlu0 %v325_v55, %s587_s8 }
  0xb3   : > { %395 = vrot.lane.b32.xlu1 %v325_v55, %s588_s9  ;;  %390 = vrot.lane.b32.xlu0 %v325_v55, %s589_s10 }
 0x10d   : > { %v333_v56 = vpop.permute.xlu1 %332  ;;  %v328_v57 = vpop.permute.xlu0 %327 }
 0x10e   : > { %331 = vst.msk [vmem:[%s644_s18] sm:$0xff] %vm330_vm0, %v328_v57 }
 0x10f   : > { %336 = vst.msk [vmem:[%s644_s18] sm:$0xff] %vm335_vm1, %v333_v56 }
 0x111   : > { %v343_v58 = vpop.permute.xlu1 %342  ;;  %v338_v59 = vpop.permute.xlu0 %337 }
 0x112   : > { %341 = vst.msk [vmem:[%s644_s18] sm:$0xff] %vm340_vm2, %v338_v59 }
 0x113   : > { %346 = vst.msk [vmem:[%s644_s18] sm:$0xff] %vm345_vm3, %v343_v58 }
 0x115   : > { %v353_v60 = vpop.permute.xlu1 %352  ;;  %v348_v61 = vpop.permute.xlu0 %347 }
 0x116   : > { %351 = vst.msk [vmem:[%s644_s18] sm:$0xff] %vm350_vm4, %v348_v61 }
 0x117   : > { %356 = vst.msk [vmem:[%s644_s18] sm:$0xff] %vm355_vm5, %v353_v60 }
 0x119   : > { %v358_v62 = vpop.permute.xlu1 %357  ;;  %v374_v63 = vpop.permute.xlu0 %373 }
 0x11a   : > { %361 = vst.msk [vmem:[%s644_s18] sm:$0xff] %vm360_vm6, %v358_v62 }
 0x11b   : > { %379 = vst.msk [vmem:[%s644_s18 + $0x8] sm:$0xff] %vm378_vm7, %v374_v63 }
 0x11d   : > { %v364_v0 = vpop.permute.xlu1 %363  ;;  %v381_v1 = vpop.permute.xlu0 %380 }
 0x11e   : > { %367 = vst.msk [vmem:[%s644_s18] sm:$0xff] %vm366_vm8, %v364_v0 }
 0x11f   : > { %384 = vst.msk [vmem:[%s644_s18 + $0x8] sm:$0xff] %vm383_vm9, %v381_v1 }
 0x121   : > { %v369_v2 = vpop.permute.xlu1 %368  ;;  %v386_v3 = vpop.permute.xlu0 %385 }
 0x122   : > { %372 = vst.msk [vmem:[%s644_s18] sm:$0xff] %vm371_vm10, %v369_v2 }
 0x123   : > { %389 = vst.msk [vmem:[%s644_s18 + $0x8] sm:$0xff] %vm388_vm11, %v386_v3 }
 0x124   : > { %377 = vst.msk [vmem:[%s644_s18] sm:$0xff] %vm376_vm12, %v374_v63 }
 0x125   : > { %v396_v4 = vpop.permute.xlu1 %395  ;;  %v391_v5 = vpop.permute.xlu0 %390 }
 0x126   : > { %394 = vst.msk [vmem:[%s644_s18 + $0x8] sm:$0xff] %vm393_vm13, %v391_v5 }
 0x127   : > { %399 = vst.msk [vmem:[%s644_s18 + $0x8] sm:$0xff] %vm398_vm14, %v396_v4 }
 0x128 PF: > { %s13_s14 = sadd.s32 1, %s570_s14   ;;  %s674_s12 = smov %s566_s13 }
 0x129   : > { %p10_p5 = scmp.ge.s32.totalorder %s13_s14, 4   ;;  %s675_s13 = smov %s677_s15 }
 0x12b   :  { %12 = sbr.rel (!%p10_p5) target bundleno = 2 (0x2), region = 62 }

</bundles_post_ra>
